<compile_context>
chip_gen: v7x
topology: tpu7x:2x2x1
jax: 0.10.0
libtpu: 0.0.40
codegen_flags: <defaults>
</compile_context>

<pallas_src>
import functools

import jax
import jax.numpy as jnp
from jax.experimental import pallas as pl
from jax.experimental.pallas import tpu as pltpu


def _round_up(x, m):
    return (x + m - 1) // m * m


def _matmul_kernel_acc(x_ref, w_ref, o_ref, acc_ref):
    """One (tm,tk) x (tk,tn) MXU matmul per grid step; f32 accumulation over K."""
    @pl.when(pl.program_id(2) == 0)
    def _():
        acc_ref[...] = jnp.zeros_like(acc_ref)

    acc_ref[...] += jnp.dot(x_ref[...], w_ref[...],
                            preferred_element_type=jnp.float32)

    @pl.when(pl.program_id(2) == pl.num_programs(2) - 1)
    def _():
        o_ref[...] = acc_ref[...].astype(o_ref.dtype)


def _matmul_kernel_single(x_ref, w_ref, o_ref):
    """Fast path: whole K dim in one tile -> no scratch, direct store."""
    o_ref[...] = jnp.dot(x_ref[...], w_ref[...],
                         preferred_element_type=jnp.float32).astype(o_ref.dtype)


@functools.partial(
    jax.jit,
    static_argnames=("out_dtype", "compute_dtype", "tm_max", "tk_max", "tn_max"))
def _fused_projection(x2d, w_fused, *, out_dtype, compute_dtype,
                      tm_max=512, tk_max=512, tn_max=512):
    """Computes x2d @ w_fused with a tiled, pipelined Pallas matmul."""
    M, K = x2d.shape
    K2, N = w_fused.shape
    assert K == K2

    # Tile sizes: MXU/lane friendly, clamped for small problems while keeping
    # the (8, 128) divisibility rule on the last two block dims.
    tm = min(tm_max, _round_up(M, 8))
    tk = min(tk_max, _round_up(K, 128))
    tn = min(tn_max, _round_up(N, 128))

    M_pad = _round_up(M, tm)
    K_pad = _round_up(K, tk)
    N_pad = _round_up(N, tn)

    x = x2d.astype(compute_dtype)
    w = w_fused.astype(compute_dtype)
    if (M_pad, K_pad) != (M, K):
        x = jnp.pad(x, ((0, M_pad - M), (0, K_pad - K)))
    if (K_pad, N_pad) != (K, N):
        w = jnp.pad(w, ((0, K_pad - K), (0, N_pad - N)))

    gm, gn, gk = M_pad // tm, N_pad // tn, K_pad // tk

    in_bytes = jnp.dtype(compute_dtype).itemsize
    out_bytes = jnp.dtype(out_dtype).itemsize
    cost = pl.CostEstimate(
        flops=2 * M_pad * K_pad * N_pad,
        transcendentals=0,
        bytes_accessed=(M_pad * K_pad + K_pad * N_pad) * in_bytes
        + M_pad * N_pad * out_bytes,
    )

    if gk == 1:
        # Single K tile: write output directly, no accumulator scratch.
        out = pl.pallas_call(
            _matmul_kernel_single,
            out_shape=jax.ShapeDtypeStruct((M_pad, N_pad), out_dtype),
            grid_spec=pltpu.PrefetchScalarGridSpec(
                num_scalar_prefetch=0,
                grid=(gm, gn),
                in_specs=[
                    pl.BlockSpec((tm, K_pad), lambda i, j: (i, 0)),
                    pl.BlockSpec((K_pad, tn), lambda i, j: (0, j)),
                ],
                out_specs=pl.BlockSpec((tm, tn), lambda i, j: (i, j)),
            ),
            compiler_params=pltpu.CompilerParams(
                dimension_semantics=("parallel", "parallel"),
                vmem_limit_bytes=48 * 1024 * 1024,
            ),
            cost_estimate=cost,
        )(x, w)
    else:
        out = pl.pallas_call(
            _matmul_kernel_acc,
            out_shape=jax.ShapeDtypeStruct((M_pad, N_pad), out_dtype),
            grid_spec=pltpu.PrefetchScalarGridSpec(
                num_scalar_prefetch=0,
                grid=(gm, gn, gk),
                in_specs=[
                    pl.BlockSpec((tm, tk), lambda i, j, k: (i, k)),
                    pl.BlockSpec((tk, tn), lambda i, j, k: (k, j)),
                ],
                out_specs=pl.BlockSpec((tm, tn), lambda i, j, k: (i, j)),
                scratch_shapes=[pltpu.VMEM((tm, tn), jnp.float32)],
            ),
            compiler_params=pltpu.CompilerParams(
                # M/N tiles independent -> megacore-shardable on v7x; K is the
                # reduction axis (accumulator resident) -> arbitrary.
                dimension_semantics=("parallel", "parallel", "arbitrary"),
                vmem_limit_bytes=48 * 1024 * 1024,
            ),
            cost_estimate=cost,
        )(x, w)

    return out[:M, :N]


class QKVCreator:
    """JAX/Pallas port of the PyTorch QKVCreator module (forward pass)."""

    def __init__(self, d_input, d_k=None, d_v=None, q_only=False, kv_only=False,
                 *, key=None, param_dtype=jnp.float32,
                 compute_dtype=jnp.bfloat16):
        if d_k is None:
            d_k = d_input
        if d_v is None:
            d_v = d_input
        if key is None:
            key = jax.random.PRNGKey(0)
        kq, kk, kv = jax.random.split(key, 3)
        # Same shapes as torch.randn((d_input, d_k)) etc. (values differ since
        # the RNG is JAX's, not torch's).
        W_q = jax.random.normal(kq, (d_input, d_k), param_dtype)
        W_k = jax.random.normal(kk, (d_input, d_k), param_dtype)
        W_v = jax.random.normal(kv, (d_input, d_v), param_dtype)
        if q_only:
            self.Ws = [W_q]
        elif kv_only:
            self.Ws = [W_k, W_v]
        else:
            self.Ws = [W_q, W_k, W_v]
        self.q_only = q_only
        self.kv_only = kv_only
        self.compute_dtype = compute_dtype
        # Fuse the projections into one weight so the kernel runs a single
        # wide (lane-dense) MXU matmul per tile.
        self._widths = [int(W.shape[1]) for W in self.Ws]
        self._w_fused = jnp.concatenate(self.Ws, axis=1)

    def __call__(self, embeddings):
        *lead, d_in = embeddings.shape
        M = 1
        for s in lead:
            M *= s
        x2d = embeddings.reshape(M, d_in)

        fused = _fused_projection(
            x2d, self._w_fused,
            out_dtype=embeddings.dtype,
            compute_dtype=self.compute_dtype,
        )

        values = []
        off = 0
        for w in self._widths:
            values.append(fused[:, off:off + w].reshape(*lead, w))
            off += w
        if len(values) == 1:
            values = values[0]
        return values


def _reference(embeddings, Ws, compute_dtype):
    """Matches the kernel's numerics: cast inputs, accumulate in f32."""
    x = embeddings.astype(compute_dtype)
    values = [
        jnp.matmul(x, W.astype(compute_dtype),
                   preferred_element_type=jnp.float32).astype(embeddings.dtype)
        for W in Ws
    ]
    if len(values) == 1:
        values = values[0]
    return values


if __name__ == "__main__":
    key = jax.random.PRNGKey(0)
    k_x, k_params, k_x2, k_params2 = jax.random.split(key, 4)

    B, S, D = 2, 8, 32          # batch, seq, hidden (d_input)
    embeddings = jax.random.normal(k_x, (B, S, D), jnp.float32)
    # NOTE: at this tiny size (one (8,128) tile) plain XLA matmul beats any
    # Pallas kernel; shapes are kept small so the self-test is cheap.  The
    # kernel itself tiles/pipelines properly at realistic (M, D, d_k).

    # Default mode (bf16 compute, f32 accumulate): Q, K, V.
    mod = QKVCreator(d_input=D, key=k_params)
    q, k, v = mod(embeddings)
    jax.block_until_ready((q, k, v))
    rq, rk, rv = _reference(embeddings, mod.Ws, jnp.bfloat16)
    assert q.shape == (B, S, D) and k.shape == (B, S, D) and v.shape == (B, S, D)
    assert jnp.allclose(q, rq, atol=1e-2, rtol=1e-2)
    assert jnp.allclose(k, rk, atol=1e-2, rtol=1e-2)
    assert jnp.allclose(v, rv, atol=1e-2, rtol=1e-2)

    # f32 compute path: tight check against the full-precision reference.
    mod32 = QKVCreator(d_input=D, key=k_params, compute_dtype=jnp.float32)
    q32, k32, v32 = mod32(embeddings)
    jax.block_until_ready((q32, k32, v32))
    rq32, rk32, rv32 = _reference(embeddings, mod32.Ws, jnp.float32)
    assert jnp.allclose(q32, rq32, atol=1e-4, rtol=1e-4)
    assert jnp.allclose(k32, rk32, atol=1e-4, rtol=1e-4)
    assert jnp.allclose(v32, rv32, atol=1e-4, rtol=1e-4)

    # q_only mode returns a single array (list unwrapped), as in PyTorch.
    mod_q = QKVCreator(d_input=D, q_only=True, key=k_params)
    q_only_out = mod_q(embeddings)
    jax.block_until_ready(q_only_out)
    assert q_only_out.shape == (B, S, D)
    assert jnp.allclose(q_only_out, _reference(embeddings, mod_q.Ws, jnp.bfloat16),
                        atol=1e-2, rtol=1e-2)

    # kv_only mode returns [K, V].
    mod_kv = QKVCreator(d_input=D, kv_only=True, key=k_params)
    k2, v2 = mod_kv(embeddings)
    jax.block_until_ready((k2, v2))
    rk2, rv2 = _reference(embeddings, mod_kv.Ws, jnp.bfloat16)
    assert jnp.allclose(k2, rk2, atol=1e-2, rtol=1e-2)
    assert jnp.allclose(v2, rv2, atol=1e-2, rtol=1e-2)

    # Exercise the multi-K-tile accumulator path with a small forced K split
    # (f32 for a tight check against the reference).
    D2 = 256
    x2 = jax.random.normal(k_x2, (B * S, D2), jnp.float32)
    w2 = jax.random.normal(k_params2, (D2, 3 * D2), jnp.float32)
    acc_out = _fused_projection(x2, w2, out_dtype=jnp.float32,
                                compute_dtype=jnp.float32, tk_max=128)
    jax.block_until_ready(acc_out)
    acc_ref = jnp.matmul(x2, w2, preferred_element_type=jnp.float32)
    assert jnp.allclose(acc_out, acc_ref, atol=1e-4, rtol=1e-4)

    print("KERNEL_OK")
</pallas_src>

<mosaic_0001>
module attributes {stable_mosaic.version = 11 : i64} {
  func.func @_matmul_kernel_single(%arg0: i32, %arg1: i32, %arg2: memref<16x128xbf16, #tpu.memory_space<vmem>>, %arg3: memref<128x128xbf16, #tpu.memory_space<vmem>>, %arg4: memref<16x128xf32, #tpu.memory_space<vmem>>) attributes {dimension_semantics = [#tpu.dimension_semantics<parallel>, #tpu.dimension_semantics<parallel>], iteration_bounds = array<i64: 1, 1>, scalar_prefetch = 0 : i64, scratch_operands = 0 : i64, tpu.core_type = #tpu.core_type<tc>, window_params = [{transform_indices = @transform_0, window_bounds = array<i64: 16, 128>}, {transform_indices = @transform_1, window_bounds = array<i64: 128, 128>}, {transform_indices = @transform_2, window_bounds = array<i64: 16, 128>}]} {
    %c0 = arith.constant 0 : index
    %c0_0 = arith.constant 0 : index
    %0 = vector.load %arg2[%c0, %c0_0] : memref<16x128xbf16, #tpu.memory_space<vmem>>, vector<16x128xbf16>
    %c0_1 = arith.constant 0 : index
    %c0_2 = arith.constant 0 : index
    %1 = vector.load %arg3[%c0_1, %c0_2] : memref<128x128xbf16, #tpu.memory_space<vmem>>, vector<128x128xbf16>
    %cst = arith.constant dense<0.000000e+00> : vector<16x128xf32>
    %2 = tpu.matmul %0, %1, %cst {dimension_numbers = #tpu.dot_dimension_numbers<[1], [0], [0], [1], [0, 0, 1, 1], [], []>} : vector<16x128xbf16>, vector<128x128xbf16>, vector<16x128xf32> -> vector<16x128xf32>
    %c0_3 = arith.constant 0 : index
    %c0_4 = arith.constant 0 : index
    %3 = vector.load %arg4[%c0_3, %c0_4] : memref<16x128xf32, #tpu.memory_space<vmem>>, vector<16x128xf32>
    tpu.vector_store %arg4[%c0_3, %c0_4], %2 {strides = array<i32>} : memref<16x128xf32, #tpu.memory_space<vmem>>, vector<16x128xf32>,
    return
  }
  func.func @transform_0(%arg0: i32, %arg1: i32) -> (i32, i32) {
    %c0_i32 = arith.constant 0 : i32
    %c0_i32_0 = arith.constant 0 : i32
    return %arg0, %c0_i32 : i32, i32
  }
  func.func @transform_1(%arg0: i32, %arg1: i32) -> (i32, i32) {
    %c0_i32 = arith.constant 0 : i32
    %c0_i32_0 = arith.constant 0 : i32
    return %c0_i32, %arg1 : i32, i32
  }
  func.func @transform_2(%arg0: i32, %arg1: i32) -> (i32, i32) {
    %c0_i32 = arith.constant 0 : i32
    return %arg0, %arg1 : i32, i32
  }
}

</mosaic_0001>

<bundles_post_ra>
// kernel: _fused_projection.1
= control target key start
LH: loop header
LB: loop body
LE: loop exit
PB: predicated region body
PF: predicated region fallthrough
CT: control target
= control target key end

     0   :  { %v220_v1 = vmov 0.0   ;;  %vm221_vm0 = vmmov 0   ;;  %s279_s0 = inlined_call_operand.vmem [shape: bf16[16,128], index: 0, kind: input, shape index: {}]   ;;  %s280_s1 = inlined_call_operand.vmem [shape: bf16[128,128], index: 1, kind: input, shape index: {}]   ;;  %s281_s2 = inlined_call_operand.hbm [shape: f32[16,128], index: 2, kind: output, shape index: {}]  }
   0x1   :  { %v187_v0 = vld [vmem:[%s280_s1] sm:$0xff]   ;;  %162 = vmatprep.subr.bf16.mxu0 %v220_v1  ;;  %v188_v2 = vld [vmem:[%s280_s1 + $0x8] sm:$0xff]   ;;  %178 = vmatprep.mubr.msk.bf16.mxu0 %vm221_vm0, %v220_v1  ;;  %v189_v3 = vld [vmem:[%s280_s1 + $0x10] sm:$0xff]  }
   0x2   :  { %163 = vmatpush3.bf16.msra.mxu0 %v187_v0 }
   0x3   :  { %164 = vmatprep.subr.bf16.mxu0 %v220_v1 }
   0x6   :  { %165 = vmatpush3.bf16.msra.mxu0 %v188_v2 }
   0x7   :  { %166 = vmatprep.subr.bf16.mxu0 %v220_v1 }
   0x8   :  { %7 = vsyncpa [#allocation3], 0  ;;  %v190_v4 = vld [vmem:[%s280_s1 + $0x18] sm:$0xff]   ;;  %v191_v5 = vld [vmem:[%s280_s1 + $0x20] sm:$0xff]   ;;  %s222_s27 = smov [#allocation2]  }
   0x9   :  { %v192_v6 = vld [vmem:[%s280_s1 + $0x28] sm:$0xff]   ;;  %v193_v7 = vld [vmem:[%s280_s1 + $0x30] sm:$0xff]   ;;  %v194_v8 = vld [vmem:[%s280_s1 + $0x38] sm:$0xff]   ;;  %s133_s28 = sshll.u32 %s222_s27, 4  ;;  %s134_s28 = int_to_ptr.vmem [resolvable:$true] %s133_s28 }
   0xa   :  { %167 = vmatpush3.bf16.msra.mxu0 %v189_v3  ;;  %v195_v9 = vld [vmem:[%s279_s0] sm:$0xff]   ;;  %s196_s29 = scalar_lea.vmem %s134_s28, 256  ;;  %p201_p1 = scmp.lt.s32.totalorder %s134_s28, %s134_s28 }
   0xb   :  { %168 = vmatprep.subr.bf16.mxu0 %v220_v1  ;;  %p197_p0 = scmp.ne.s32.totalorder %s134_s28, %s196_s29  ;;  %p202_p2 = scmp.lt.s32.totalorder %s196_s29, %s196_s29 }
   0xd   :  { %p203_p3 = por %p202_p2, %p201_p1 }
   0xe   :  { %169 = vmatpush3.bf16.msra.mxu0 %v190_v4 }
   0xf   :  { %170 = vmatprep.subr.bf16.mxu0 %v220_v1  ;;  %p204_p4 = pnand %p203_p3, %p197_p0 }
  0x12   :  { %171 = vmatpush3.bf16.msra.mxu0 %v191_v5 }
  0x13   :  { %172 = vmatprep.subr.bf16.mxu0 %v220_v1 }
  0x16   :  { %173 = vmatpush3.bf16.msra.mxu0 %v192_v6 }
  0x17   :  { %174 = vmatprep.subr.bf16.mxu0 %v220_v1 }
  0x1a   :  { %175 = vmatpush3.bf16.msra.mxu0 %v193_v7 }
  0x1b   :  { %176 = vmatprep.subr.bf16.mxu0 %v220_v1 }
  0x1e   :  { %177 = vmatpush3.bf16.msra.mxu0 %v194_v8 }
  0x21   :  { %179 = vmatmul.mubr.bf16.vlgmr.msra.gmra.mrb[0].mxu0 %v195_v9 }
  0xf4   :  { %v119_v10 = vpop.f32.mrb[0].mxu0 }
  0xf5   :  { %126 = vst [vmem:[#allocation2] sm:$0xff] %v119_v10  ;;  %v180_v11 = vpop.f32.mrb[1].mxu0 }
  0xf6   :  { %v122_v12 = vpop.f32.mrb[2].mxu0 }
  0xf7   :  { %127 = vst [vmem:[#allocation2 + $0x8] sm:$0xff] %v122_v12  ;;  %v181_v13 = vpop.f32.mrb[3].mxu0 }
  0xf8   :  { %207 = shalt.err (!%p204_p4)
}
  0xf9   :  { %s208_s30 = scalar_lea.hbm %s281_s2, 256 }
  0xfa   :  { %p209_p5 = scmp.ne.s32.totalorder %s281_s2, %s208_s30  ;;  %p212_p6 = scmp.lt.u32.totalorder %s208_s30, %s281_s2 }
  0xfc   :  { %p214_p7 = pnand %p212_p6, %p209_p5 }
  0xfe   :  { %217 = shalt.err (!%p214_p7)
}
  0xff   :  { %s223_s7 = smov 128   ;;  %s224_s8 = smov 8  }
 0x100   :  { %139 = dma.vmem_to_hbm [thread:$0]  %s134_s28, 256, %s281_s2, [#allocation3], %s223_s7, %s223_s7, %s224_s8  }
 0x101   :  { %218 = dma.done.wait [#allocation3], 256  }
 0x102   :  { %219 = vsyncadd [#allocation3], 4294967040 }
 0x103   :  { %143 = vsyncpa [#allocation3], 1 }

</bundles_post_ra>
